<compile_context>
chip_gen: v5e
topology: v5e:2x2
jax: 0.10.0
libtpu: 0.0.40
codegen_flags: <defaults>
</compile_context>

<pallas_src>
import jax
import jax.numpy as jnp
from jax.experimental import pallas as pl
from jax.experimental.pallas import tpu as pltpu


def _round_up(x, m):
    return (x + m - 1) // m * m


def _amdr_cls_kernel(xcat_ref, wenc_ref, benc_ref, wc_ref, bc_ref, y_ref):
    """y = ((concat-inputs @ block-diag W_enc + b_enc) @ Wc + bc)  per batch tile."""
    # --- fused frozen encoders (torch.no_grad() path): one MXU matmul ---
    z = jnp.dot(xcat_ref[...], wenc_ref[...],
                preferred_element_type=jnp.float32)
    z = z + benc_ref[...]                      # f32 bias add (VPU)
    # --- fused classifier: one MXU matmul on bf16 operands, f32 accumulate ---
    z = z.astype(wc_ref.dtype)
    y = jnp.dot(z, wc_ref[...],
                preferred_element_type=jnp.float32) + bc_ref[...]
    y_ref[...] = y.astype(y_ref.dtype)


def prepare_fused_params(params, compute_dtype=jnp.bfloat16, lane=128):
    """Build the fused / padded parameter set once (param-prep time)."""
    (wv, bv, w1, b1, w2, b2, wcx, wc1, wc2, bc) = params
    dx, zx = wv.shape
    da1, z1 = w1.shape
    da2, z2 = w2.shape
    din = dx + da1 + da2
    z = zx + z1 + z2
    c = bc.shape[-1]
    c_pad = _round_up(c, lane)                 # lane-dense output width

    # Block-diagonal encoder weight over the concatenated input.
    w_enc = jnp.zeros((din, z), jnp.float32)
    w_enc = w_enc.at[:dx, :zx].set(wv)
    w_enc = w_enc.at[dx:dx + da1, zx:zx + z1].set(w1)
    w_enc = w_enc.at[dx + da1:, zx + z1:].set(w2)
    b_enc = jnp.concatenate([bv, b1, b2], axis=-1)

    # Single classifier weight over the concatenated latent, padded to 128 lanes.
    wc = jnp.concatenate([wcx, wc1, wc2], axis=0)
    wc_pad = jnp.zeros((z, c_pad), jnp.float32).at[:, :c].set(wc)
    bc_pad = jnp.zeros((1, c_pad), jnp.float32).at[:, :c].set(bc)

    return dict(
        w_enc=w_enc.astype(compute_dtype),
        b_enc=b_enc.astype(jnp.float32),
        wc=wc_pad.astype(compute_dtype),
        bc=bc_pad.astype(jnp.float32),
        num_classes=c,
        compute_dtype=compute_dtype,
    )


def amdr_cls_forward(x, a1, a2, fused, *, tb=256):
    """Fused AMDR_CLS forward.  x:[B,Dx], a1:[B,Da1], a2:[B,Da2] -> [B,C] (f32)."""
    compute_dtype = fused["compute_dtype"]
    x_cat = jnp.concatenate([x, a1, a2], axis=-1).astype(compute_dtype)

    B, Din = x_cat.shape
    Z = fused["w_enc"].shape[1]
    Cp = fused["wc"].shape[1]
    C = fused["num_classes"]

    # Batch tile: multiple of 8 (sublane), large enough to amortize per-step
    # overhead, small enough for v7x's 64 MiB VMEM at these feature widths.
    TB = min(tb, _round_up(B, 8))
    B_pad = _round_up(B, TB)
    if B_pad != B:
        x_cat = jnp.pad(x_cat, ((0, B_pad - B), (0, 0)))

    grid = (B_pad // TB,)

    itemsize = jnp.dtype(compute_dtype).itemsize
    flops = 2 * B_pad * (Din * Z + Z * Cp)
    bytes_accessed = (x_cat.size * itemsize
                      + fused["w_enc"].size * itemsize
                      + fused["b_enc"].size * 4
                      + fused["wc"].size * itemsize
                      + fused["bc"].size * 4
                      + B_pad * Cp * 4)

    y_pad = pl.pallas_call(
        _amdr_cls_kernel,
        out_shape=jax.ShapeDtypeStruct((B_pad, Cp), jnp.float32),
        grid=grid,
        in_specs=[
            # batch-tiled activations (pipelined across the grid)
            pl.BlockSpec((TB, Din), lambda i: (i, 0)),
            # resident weights / biases (constant index_map -> no re-DMA)
            pl.BlockSpec((Din, Z), lambda i: (0, 0)),
            pl.BlockSpec((1, Z), lambda i: (0, 0)),
            pl.BlockSpec((Z, Cp), lambda i: (0, 0)),
            pl.BlockSpec((1, Cp), lambda i: (0, 0)),
        ],
        out_specs=pl.BlockSpec((TB, Cp), lambda i: (i, 0)),
        compiler_params=pltpu.CompilerParams(
            dimension_semantics=("parallel",)),   # megacore-shard the batch axis
        cost_estimate=pl.CostEstimate(
            flops=flops, transcendentals=0, bytes_accessed=bytes_accessed),
    )(x_cat, fused["w_enc"], fused["b_enc"], fused["wc"], fused["bc"])

    # Strip batch padding and the lane padding of the class dimension.
    return y_pad[:B, :C]


def _reference(x, a1, a2, params):
    (wv, bv, w1, b1, w2, b2, wcx, wc1, wc2, bc) = params
    z_mu = x @ wv + bv
    mu1 = a1 @ w1 + b1
    mu2 = a2 @ w2 + b2
    z = jnp.concatenate([z_mu, mu1, mu2], axis=-1)
    wc = jnp.concatenate([wcx, wc1, wc2], axis=0)
    return z @ wc + bc


def make_params(key, dx, da1, da2, zx, z1, z2, n_cls):
    ks = jax.random.split(key, 10)
    scale = 0.1
    wv = scale * jax.random.normal(ks[0], (dx, zx), jnp.float32)
    bv = scale * jax.random.normal(ks[1], (1, zx), jnp.float32)
    w1 = scale * jax.random.normal(ks[2], (da1, z1), jnp.float32)
    b1 = scale * jax.random.normal(ks[3], (1, z1), jnp.float32)
    w2 = scale * jax.random.normal(ks[4], (da2, z2), jnp.float32)
    b2 = scale * jax.random.normal(ks[5], (1, z2), jnp.float32)
    wcx = scale * jax.random.normal(ks[6], (zx, n_cls), jnp.float32)
    wc1 = scale * jax.random.normal(ks[7], (z1, n_cls), jnp.float32)
    wc2 = scale * jax.random.normal(ks[8], (z2, n_cls), jnp.float32)
    bc = scale * jax.random.normal(ks[9], (1, n_cls), jnp.float32)
    return (wv, bv, w1, b1, w2, b2, wcx, wc1, wc2, bc)


if __name__ == "__main__":
    # small synthetic shapes implied by the forward:
    B, Dx, Da1, Da2 = 8, 32, 16, 16      # inputs
    Zx, Z1, Z2, C = 16, 8, 8, 4          # latent dims and class count

    key = jax.random.PRNGKey(0)
    kx, ka1, ka2, kp = jax.random.split(key, 4)
    x = jax.random.normal(kx, (B, Dx), jnp.float32)
    a1 = jax.random.normal(ka1, (B, Da1), jnp.float32)
    a2 = jax.random.normal(ka2, (B, Da2), jnp.float32)
    params = make_params(kp, Dx, Da1, Da2, Zx, Z1, Z2, C)

    fused = prepare_fused_params(params, compute_dtype=jnp.bfloat16)
    y = amdr_cls_forward(x, a1, a2, fused)
    y = jax.block_until_ready(y)

    y_ref = _reference(x, a1, a2, params)
    assert y.shape == (B, C)
    max_err = float(jnp.max(jnp.abs(y - y_ref)))
    # bf16 operands / f32 accumulation -> small quantization error vs f32 ref.
    assert max_err < 3e-2, f"mismatch vs reference (max abs err {max_err})"

    # TODO(synk): vae/ame1/ame2/cls internals are not specified in p2ammidr.py;
    # they are modelled as single affine mean-heads / linear classifier.
    print("KERNEL_OK")
</pallas_src>

<mosaic_0001>
module attributes {stable_mosaic.version = 11 : i64} {
  func.func @_amdr_cls_kernel(%arg0: i32, %arg1: memref<8x64xbf16, #tpu.memory_space<vmem>>, %arg2: memref<64x32xbf16, #tpu.memory_space<vmem>>, %arg3: memref<1x32xf32, #tpu.memory_space<vmem>>, %arg4: memref<32x128xbf16, #tpu.memory_space<vmem>>, %arg5: memref<1x128xf32, #tpu.memory_space<vmem>>, %arg6: memref<8x128xf32, #tpu.memory_space<vmem>>) attributes {dimension_semantics = [#tpu.dimension_semantics<parallel>], iteration_bounds = array<i64: 1>, scalar_prefetch = 0 : i64, scratch_operands = 0 : i64, tpu.core_type = #tpu.core_type<tc>, window_params = [{transform_indices = @transform_0, window_bounds = array<i64: 8, 64>}, {pipeline_mode = #tpu.pipeline_mode<synchronous>, transform_indices = @transform_1, window_bounds = array<i64: 64, 32>}, {pipeline_mode = #tpu.pipeline_mode<synchronous>, transform_indices = @transform_2, window_bounds = array<i64: 1, 32>}, {pipeline_mode = #tpu.pipeline_mode<synchronous>, transform_indices = @transform_3, window_bounds = array<i64: 32, 128>}, {pipeline_mode = #tpu.pipeline_mode<synchronous>, transform_indices = @transform_4, window_bounds = array<i64: 1, 128>}, {transform_indices = @transform_5, window_bounds = array<i64: 8, 128>}]} {
    %c0 = arith.constant 0 : index
    %c0_0 = arith.constant 0 : index
    %0 = vector.load %arg1[%c0, %c0_0] : memref<8x64xbf16, #tpu.memory_space<vmem>>, vector<8x64xbf16>
    %c0_1 = arith.constant 0 : index
    %c0_2 = arith.constant 0 : index
    %1 = vector.load %arg2[%c0_1, %c0_2] : memref<64x32xbf16, #tpu.memory_space<vmem>>, vector<64x32xbf16>
    %cst = arith.constant dense<0.000000e+00> : vector<8x32xf32>
    %2 = tpu.matmul %0, %1, %cst {dimension_numbers = #tpu.dot_dimension_numbers<[1], [0], [0], [1], [0, 0, 1, 1], [], []>} : vector<8x64xbf16>, vector<64x32xbf16>, vector<8x32xf32> -> vector<8x32xf32>
    %c0_3 = arith.constant 0 : index
    %c0_4 = arith.constant 0 : index
    %3 = vector.load %arg3[%c0_3, %c0_4] : memref<1x32xf32, #tpu.memory_space<vmem>>, vector<1x32xf32>
    %4 = vector.broadcast %3 : vector<1x32xf32> to vector<8x32xf32>
    %5 = arith.addf %2, %4 : vector<8x32xf32>
    %6 = arith.truncf %5 : vector<8x32xf32> to vector<8x32xbf16>
    %c0_5 = arith.constant 0 : index
    %c0_6 = arith.constant 0 : index
    %7 = vector.load %arg4[%c0_5, %c0_6] : memref<32x128xbf16, #tpu.memory_space<vmem>>, vector<32x128xbf16>
    %cst_7 = arith.constant dense<0.000000e+00> : vector<8x128xf32>
    %8 = tpu.matmul %6, %7, %cst_7 {dimension_numbers = #tpu.dot_dimension_numbers<[1], [0], [0], [1], [0, 0, 1, 1], [], []>} : vector<8x32xbf16>, vector<32x128xbf16>, vector<8x128xf32> -> vector<8x128xf32>
    %c0_8 = arith.constant 0 : index
    %c0_9 = arith.constant 0 : index
    %9 = vector.load %arg5[%c0_8, %c0_9] : memref<1x128xf32, #tpu.memory_space<vmem>>, vector<1x128xf32>
    %10 = vector.broadcast %9 : vector<1x128xf32> to vector<8x128xf32>
    %11 = arith.addf %8, %10 : vector<8x128xf32>
    %c0_10 = arith.constant 0 : index
    %c0_11 = arith.constant 0 : index
    %12 = vector.load %arg6[%c0_10, %c0_11] : memref<8x128xf32, #tpu.memory_space<vmem>>, vector<8x128xf32>
    tpu.vector_store %arg6[%c0_10, %c0_11], %11 {strides = array<i32>} : memref<8x128xf32, #tpu.memory_space<vmem>>, vector<8x128xf32>,
    return
  }
  func.func @transform_0(%arg0: i32) -> (i32, i32) {
    %c0_i32 = arith.constant 0 : i32
    %c0_i32_0 = arith.constant 0 : i32
    return %arg0, %c0_i32 : i32, i32
  }
  func.func @transform_1(%arg0: i32) -> (i32, i32) {
    %c0_i32 = arith.constant 0 : i32
    %c0_i32_0 = arith.constant 0 : i32
    %c0_i32_1 = arith.constant 0 : i32
    return %c0_i32, %c0_i32_0 : i32, i32
  }
  func.func @transform_2(%arg0: i32) -> (i32, i32) {
    %c0_i32 = arith.constant 0 : i32
    %c0_i32_0 = arith.constant 0 : i32
    %c0_i32_1 = arith.constant 0 : i32
    return %c0_i32, %c0_i32_0 : i32, i32
  }
  func.func @transform_3(%arg0: i32) -> (i32, i32) {
    %c0_i32 = arith.constant 0 : i32
    %c0_i32_0 = arith.constant 0 : i32
    %c0_i32_1 = arith.constant 0 : i32
    return %c0_i32, %c0_i32_0 : i32, i32
  }
  func.func @transform_4(%arg0: i32) -> (i32, i32) {
    %c0_i32 = arith.constant 0 : i32
    %c0_i32_0 = arith.constant 0 : i32
    %c0_i32_1 = arith.constant 0 : i32
    return %c0_i32, %c0_i32_0 : i32, i32
  }
  func.func @transform_5(%arg0: i32) -> (i32, i32) {
    %c0_i32 = arith.constant 0 : i32
    %c0_i32_0 = arith.constant 0 : i32
    return %arg0, %c0_i32 : i32, i32
  }
}

</mosaic_0001>

<bundles_post_ra>
// kernel: tpu_custom_call.1
= control target key start
LH: loop header
LB: loop body
LE: loop exit
PB: predicated region body
PF: predicated region fallthrough
CT: control target
= control target key end

     0   :  { %s253_s0 = inlined_call_operand.vmem [shape: bf16[8,64], index: 0, kind: input, shape index: {}]   ;;  %s254_s1 = inlined_call_operand.vmem [shape: bf16[64,32], index: 1, kind: input, shape index: {}]   ;;  %s255_s2 = inlined_call_operand.vmem [shape: f32[1,32], index: 2, kind: input, shape index: {}]   ;;  %s256_s3 = inlined_call_operand.vmem [shape: bf16[32,128], index: 3, kind: input, shape index: {}]   ;;  %s257_s4 = inlined_call_operand.vmem [shape: f32[1,128], index: 4, kind: input, shape index: {}]   ;;  %s258_s5 = inlined_call_operand.hbm [shape: f32[8,128], index: 5, kind: output, shape index: {}]  }
   0x1   :  { %v160_v0 = vld [vmem:[%s254_s1 + $0x18] sm:$0xff]  ;;  %v162_v1 = vld [vmem:[%s256_s3 + $0x8] sm:$0xff]  ;;  %v159_v2 = vld [vmem:[%s254_s1 + $0x10] sm:$0xff] }
   0x2   :  { %67 = vmatpush.bf16.msra.mxu0 %v160_v0  ;;  %107 = vmatpush.bf16.msra.mxu1 %v162_v1 }
   0x3   :  { %10 = vsyncpa [#allocation3], 0  ;;  %v158_v3 = vld [vmem:[%s254_s1 + $0x8] sm:$0xff]  ;;  %v157_v4 = vld [vmem:[%s254_s1] sm:$0xff]  ;;  %vm59_vm0 = vcmask 523264   ;;  %vm97_vm1 = vcmask 261120  }
   0x4   :  { %v22_v5 = vld [vmem:[%s253_s0] sm:$0xf]  ;;  %s192_s0 = smov [#allocation2]  }
   0x5   :  { %v161_v6 = vld [vmem:[%s256_s3] sm:$0xff]  ;;  %s120_s10 = sshll.u32 %s192_s0, 4  ;;  %s122_s3 = sshll.u32 %s258_s5, 4  ;;  %s121_s10 = int_to_ptr.vmem [resolvable:$true] %s120_s10  ;;  %s123_s3 = int_to_ptr.hbm [resolvable:$true] %s122_s3 }
   0x6   :  { %68 = vmatpush.bf16.msra.mxu0 %v159_v2  ;;  %108 = vmatpush.bf16.msra.mxu1 %v161_v6  ;;  %v164_v7 = vld [vmem:[%s255_s2] ss:$0 sm:$0xff] }
   0x7   :  { %v165_v12 = vld [vmem:[%s257_s4] ss:$0 sm:$0xff] }
   0xa   :  { %69 = vmatpush.bf16.msra.mxu0 %v158_v3 }
   0xe   :  { %70 = vmatpush.bf16.msra.mxu0 %v157_v4 }
  0x11   :  { %147 = vmatmul.msk.bf16.vlgmr.msra.gmra.mxu0 %vm59_vm0, %v22_v5 }
  0x8e   :  { %v72_v8 = vpop.f32.mrf.mxu0 }
  0x8f   :  { %v73_v9 = vadd.f32 %v164_v7, %v72_v8 }
  0x91   :  { %v76_v10 = vpack.c.bf16 %v73_v9, %v73_v9 }
  0x93   :  { %156 = vmatmul.msk.bf16.vlgmr.msra.gmra.mxu1 %vm97_vm1, %v76_v10 }
  0x96   :  { %v74_v11 = vpop.f32.mrf.mxu0 }
 0x110   :  { %v110_v13 = vpop.f32.mrf.mxu1 }
 0x111   :  { %v111_v14 = vadd.f32 %v165_v12, %v110_v13 }
 0x113   :  { %114 = vst [vmem:[#allocation2] sm:$0xff] %v111_v14 }
 0x114   :  { %125 = dma.vmem_to_hbm [thread:$0]  %s121_s10, 128, %s123_s3, [#allocation3]  }
 0x118   :  { %v112_v15 = vpop.f32.mrf.mxu1 }
 0x119   :  { %190 = dma.done.wait [#allocation3], 128  }
 0x11a   :  { %191 = vsyncadd [#allocation3], 4294967168 }
 0x11b   :  { %130 = vsyncpa [#allocation3], 1 }

</bundles_post_ra>
